<compile_context>
chip_gen: v5e
topology: v5e:2x2
jax: 0.10.0
libtpu: 0.0.40
codegen_flags: <defaults>
</compile_context>

<pallas_src>
import functools

import jax
import jax.numpy as jnp
from jax import lax
from jax.experimental import pallas as pl
from jax.experimental.pallas import tpu as pltpu

LANES = 128
MAX_TILE_ROWS = 1024  # 1024 * 128 * 4 B = 512 KiB per f32 input tile


def _cdiv(a, b):
    return -(-a // b)


def _focal_loss_kernel(x_ref, t_ref, o_ref, acc_ref, *,
                       alpha, gamma, tile_rows, tiles_per_shard, valid_rows):
    s = pl.program_id(0)  # shard axis ("parallel")
    i = pl.program_id(1)  # tile-within-shard axis ("arbitrary" reduction)

    @pl.when(i == 0)
    def _():
        acc_ref[...] = jnp.zeros_like(acc_ref)

    p = x_ref[...].astype(jnp.float32)
    t = t_ref[...].astype(jnp.float32)

    # F.binary_cross_entropy clamps log terms at -100 (PyTorch semantics).
    log_p = jnp.maximum(jnp.log(p), -100.0)
    log_1mp = jnp.maximum(jnp.log(1.0 - p), -100.0)
    bce = -(t * log_p + (1.0 - t) * log_1mp)

    pt = jnp.exp(-bce)
    one_minus_pt = 1.0 - pt

    if float(gamma) == int(gamma) and int(gamma) >= 0:
        # Integer power -> VPU multiply chain (no exp/log pow on the EUP).
        w = lax.integer_pow(one_minus_pt, int(gamma))
    else:
        w = one_minus_pt ** jnp.float32(gamma)

    f_loss = jnp.float32(alpha) * w * bce

    # Zero rows outside the real data: ragged last tile and the clamped
    # "overflow" steps of the trailing shard (their DMA re-reads the last
    # valid tile, but the unclamped global row index masks them out).
    row_ids = lax.broadcasted_iota(jnp.int32, f_loss.shape, 0)
    global_row = (s * tiles_per_shard + i) * tile_rows + row_ids
    f_loss = jnp.where(global_row < valid_rows, f_loss, 0.0)

    # Per-step VPU-only accumulation into the VMEM vector accumulator.
    acc_ref[...] += f_loss

    @pl.when(i == pl.num_programs(1) - 1)
    def _():
        total = jnp.sum(acc_ref[...])              # one cross-lane reduce per shard
        o_ref[...] = jnp.zeros_like(o_ref) + total # broadcast partial sum into block


def focal_loss(inputs, targets, alpha=0.5, gamma=2, logits=False, reduce=True):
    """Pallas TPU FocalLoss forward (default config: probabilities in, scalar out)."""
    assert inputs.shape == targets.shape
    if logits:
        # TODO(synk): logits=True branch (BCE-with-logits) not wired into the kernel;
        # the default module config uses logits=False.
        raise NotImplementedError("logits=True path not implemented")
    if not reduce:
        # TODO(synk): reduce=False (per-element loss output) not implemented.
        raise NotImplementedError("reduce=False path not implemented")

    n_true = int(inputs.size)

    # Flatten; keep the native dtype (cast happens inside the kernel).
    x = inputs.reshape(-1)
    t = targets.reshape(-1)

    # Only pad up to one 128-lane row when needed (<=127 elements); the
    # (p=1, t=1) pad pairs contribute exactly zero focal loss.
    rem = (-n_true) % LANES
    if rem:
        x = jnp.concatenate([x, jnp.ones((rem,), x.dtype)])
        t = jnp.concatenate([t, jnp.ones((rem,), t.dtype)])

    rows = x.shape[0] // LANES
    x2 = x.reshape(rows, LANES)
    t2 = t.reshape(rows, LANES)

    # Large lane-dense row tiles; tiny inputs get a single full-array tile.
    tile_rows = rows if rows <= MAX_TILE_ROWS else MAX_TILE_ROWS
    total_tiles = _cdiv(rows, tile_rows)

    # Leading "parallel" axis lets v7x's two TensorCores split the reduction
    # (harmless serial loop on single-TC v5e/v6e).
    n_shards = 2 if total_tiles >= 2 else 1
    tiles_per_shard = _cdiv(total_tiles, n_shards)

    def tile_index_map(s, i):
        # Clamp so DMAs of trailing overflow steps stay in bounds; their
        # contribution is zeroed by the in-kernel row mask.
        tidx = jnp.minimum(s * tiles_per_shard + i, total_tiles - 1)
        return (tidx, 0)

    kernel = functools.partial(
        _focal_loss_kernel,
        alpha=float(alpha), gamma=gamma, tile_rows=tile_rows,
        tiles_per_shard=tiles_per_shard, valid_rows=rows,
    )

    partials = pl.pallas_call(
        kernel,
        out_shape=jax.ShapeDtypeStruct((n_shards, 8, LANES), jnp.float32),
        grid_spec=pltpu.PrefetchScalarGridSpec(
            num_scalar_prefetch=0,
            grid=(n_shards, tiles_per_shard),
            in_specs=[
                pl.BlockSpec((tile_rows, LANES), tile_index_map),
                pl.BlockSpec((tile_rows, LANES), tile_index_map),
            ],
            out_specs=pl.BlockSpec((1, 8, LANES), lambda s, i: (s, 0, 0)),
            scratch_shapes=[pltpu.VMEM((tile_rows, LANES), jnp.float32)],
        ),
        compiler_params=pltpu.CompilerParams(
            dimension_semantics=("parallel", "arbitrary"),
        ),
    )(x2, t2)

    # Each shard's block holds its partial sum broadcast; combine & normalize.
    return jnp.sum(partials[:, 0, 0]) / jnp.float32(n_true)


def _focal_loss_ref(inputs, targets, alpha=0.5, gamma=2):
    p = inputs.astype(jnp.float32)
    t = targets.astype(jnp.float32)
    bce = -(t * jnp.maximum(jnp.log(p), -100.0)
            + (1.0 - t) * jnp.maximum(jnp.log(1.0 - p), -100.0))
    pt = jnp.exp(-bce)
    return jnp.mean(alpha * (1.0 - pt) ** gamma * bce)


if __name__ == "__main__":
    key = jax.random.PRNGKey(0)
    k1, k2 = jax.random.split(key)

    # Small canonical NCHW probability tensors (FocalLoss expects probabilities).
    shape = (2, 4, 16, 16)
    inputs = jax.random.uniform(k1, shape, dtype=jnp.float32,
                                minval=0.01, maxval=0.99)
    targets = (jax.random.uniform(k2, shape, dtype=jnp.float32) > 0.5).astype(
        jnp.float32
    )

    loss = focal_loss(inputs, targets, alpha=0.5, gamma=2)
    loss = jax.block_until_ready(loss)
    ref = _focal_loss_ref(inputs, targets, alpha=0.5, gamma=2)
    assert jnp.allclose(loss, ref, rtol=1e-5, atol=1e-6), (loss, ref)

    # Secondary check exercising the multi-tile / two-shard / ragged-tile path.
    k3, k4 = jax.random.split(k1)
    shape2 = (4, 8, 128, 130)  # 532480 elems -> 4160 rows -> 5 tiles, 2 shards
    inputs2 = jax.random.uniform(k3, shape2, dtype=jnp.float32,
                                 minval=0.01, maxval=0.99)
    targets2 = (jax.random.uniform(k4, shape2, dtype=jnp.float32) > 0.5).astype(
        jnp.float32
    )
    loss2 = jax.block_until_ready(focal_loss(inputs2, targets2, alpha=0.5, gamma=2))
    ref2 = _focal_loss_ref(inputs2, targets2, alpha=0.5, gamma=2)
    assert jnp.allclose(loss2, ref2, rtol=1e-5, atol=1e-6), (loss2, ref2)

    print("KERNEL_OK")
</pallas_src>

<mosaic_0001>
module attributes {stable_mosaic.version = 11 : i64} {
  func.func @_focal_loss_kernel(%arg0: i32, %arg1: i32, %arg2: memref<16x128xf32, #tpu.memory_space<vmem>>, %arg3: memref<16x128xf32, #tpu.memory_space<vmem>>, %arg4: memref<1x8x128xf32, #tpu.memory_space<vmem>>, %arg5: memref<16x128xf32, #tpu.memory_space<vmem>>) attributes {dimension_semantics = [#tpu.dimension_semantics<parallel>, #tpu.dimension_semantics<arbitrary>], iteration_bounds = array<i64: 1, 1>, scalar_prefetch = 0 : i64, scratch_operands = 1 : i64, tpu.core_type = #tpu.core_type<tc>, window_params = [{transform_indices = @transform_0, window_bounds = array<i64: 16, 128>}, {transform_indices = @transform_1, window_bounds = array<i64: 16, 128>}, {transform_indices = @transform_2, window_bounds = array<i64: 1, 8, 128>}]} {
    %c0_i32 = arith.constant 0 : i32
    %0 = arith.cmpi eq, %arg1, %c0_i32 : i32
    %1 = arith.extui %0 : i1 to i32
    %c0_i32_0 = arith.constant 0 : i32
    %2 = arith.cmpi ne, %1, %c0_i32_0 : i32
    scf.if %2 {
      %cst_19 = arith.constant 0.000000e+00 : f32
      %45 = vector.broadcast %cst_19 : f32 to vector<16x128xf32>
      %c0_20 = arith.constant 0 : index
      %c0_21 = arith.constant 0 : index
      %46 = vector.load %arg5[%c0_20, %c0_21] : memref<16x128xf32, #tpu.memory_space<vmem>>, vector<16x128xf32>
      tpu.vector_store %arg5[%c0_20, %c0_21], %45 {strides = array<i32>} : memref<16x128xf32, #tpu.memory_space<vmem>>, vector<16x128xf32>,
    } else {
    }
    %c0 = arith.constant 0 : index
    %c0_1 = arith.constant 0 : index
    %3 = vector.load %arg2[%c0, %c0_1] : memref<16x128xf32, #tpu.memory_space<vmem>>, vector<16x128xf32>
    %c0_2 = arith.constant 0 : index
    %c0_3 = arith.constant 0 : index
    %4 = vector.load %arg3[%c0_2, %c0_3] : memref<16x128xf32, #tpu.memory_space<vmem>>, vector<16x128xf32>
    %5 = math.log %3 : vector<16x128xf32>
    %cst = arith.constant -1.000000e+02 : f32
    %6 = vector.broadcast %cst : f32 to vector<16x128xf32>
    %7 = arith.maximumf %5, %6 : vector<16x128xf32>
    %cst_4 = arith.constant 1.000000e+00 : f32
    %8 = vector.broadcast %cst_4 : f32 to vector<16x128xf32>
    %9 = arith.subf %8, %3 : vector<16x128xf32>
    %10 = math.log %9 : vector<16x128xf32>
    %cst_5 = arith.constant -1.000000e+02 : f32
    %11 = vector.broadcast %cst_5 : f32 to vector<16x128xf32>
    %12 = arith.maximumf %10, %11 : vector<16x128xf32>
    %13 = arith.mulf %4, %7 : vector<16x128xf32>
    %cst_6 = arith.constant 1.000000e+00 : f32
    %14 = vector.broadcast %cst_6 : f32 to vector<16x128xf32>
    %15 = arith.subf %14, %4 : vector<16x128xf32>
    %16 = arith.mulf %15, %12 : vector<16x128xf32>
    %17 = arith.addf %13, %16 : vector<16x128xf32>
    %cst_7 = arith.constant 0.000000e+00 : f32
    %18 = vector.broadcast %cst_7 : f32 to vector<16x128xf32>
    %19 = arith.subf %18, %17 : vector<16x128xf32>
    %cst_8 = arith.constant 0.000000e+00 : f32
    %20 = vector.broadcast %cst_8 : f32 to vector<16x128xf32>
    %21 = arith.subf %20, %19 : vector<16x128xf32>
    %22 = math.exp %21 : vector<16x128xf32>
    %cst_9 = arith.constant 1.000000e+00 : f32
    %23 = vector.broadcast %cst_9 : f32 to vector<16x128xf32>
    %24 = arith.subf %23, %22 : vector<16x128xf32>
    %25 = arith.mulf %24, %24 : vector<16x128xf32>
    %cst_10 = arith.constant 5.000000e-01 : f32
    %26 = vector.broadcast %cst_10 : f32 to vector<16x128xf32>
    %27 = arith.mulf %26, %25 : vector<16x128xf32>
    %28 = arith.mulf %27, %19 : vector<16x128xf32>
    %29 = tpu.iota {dimensions = array<i32: 0>} : vector<16x128xi32>
    %c1_i32 = arith.constant 1 : i32
    %30 = arith.muli %arg0, %c1_i32 : i32
    %31 = arith.addi %30, %arg1 : i32
    %c16_i32 = arith.constant 16 : i32
    %32 = arith.muli %31, %c16_i32 : i32
    %33 = vector.broadcast %32 : i32 to vector<16x128xi32>
    %34 = arith.addi %33, %29 : vector<16x128xi32>
    %c16_i32_11 = arith.constant 16 : i32
    %35 = vector.broadcast %c16_i32_11 : i32 to vector<16x128xi32>
    %36 = arith.cmpi slt, %34, %35 : vector<16x128xi32>
    %cst_12 = arith.constant 0.000000e+00 : f32
    %37 = vector.broadcast %cst_12 : f32 to vector<16x128xf32>
    %38 = arith.select %36, %28, %37 : vector<16x128xi1>, vector<16x128xf32>
    %c0_13 = arith.constant 0 : index
    %c0_14 = arith.constant 0 : index
    %39 = vector.load %arg5[%c0_13, %c0_14] : memref<16x128xf32, #tpu.memory_space<vmem>>, vector<16x128xf32>
    %40 = arith.addf %39, %38 : vector<16x128xf32>
    %c0_15 = arith.constant 0 : index
    %c0_16 = arith.constant 0 : index
    %41 = vector.load %arg5[%c0_15, %c0_16] : memref<16x128xf32, #tpu.memory_space<vmem>>, vector<16x128xf32>
    tpu.vector_store %arg5[%c0_15, %c0_16], %40 {strides = array<i32>} : memref<16x128xf32, #tpu.memory_space<vmem>>, vector<16x128xf32>,
    %c0_i32_17 = arith.constant 0 : i32
    %42 = arith.cmpi eq, %arg1, %c0_i32_17 : i32
    %43 = arith.extui %42 : i1 to i32
    %c0_i32_18 = arith.constant 0 : i32
    %44 = arith.cmpi ne, %43, %c0_i32_18 : i32
    scf.if %44 {
      %c0_19 = arith.constant 0 : index
      %c0_20 = arith.constant 0 : index
      %45 = vector.load %arg5[%c0_19, %c0_20] : memref<16x128xf32, #tpu.memory_space<vmem>>, vector<16x128xf32>
      %46 = vector.shape_cast %45 : vector<16x128xf32> to vector<1x16x128xf32>
      %cst_21 = arith.constant dense<0.000000e+00> : vector<1xf32>
      %47 = vector.multi_reduction <add>, %46, %cst_21 [1, 2] : vector<1x16x128xf32> to vector<1xf32>
      %48 = vector.shape_cast %47 : vector<1xf32> to vector<1x1x1xf32>
      %49 = vector.extract %48[0, 0, 0] : f32 from vector<1x1x1xf32>
      %cst_22 = arith.constant 0.000000e+00 : f32
      %50 = vector.broadcast %cst_22 : f32 to vector<1x8x128xf32>
      %51 = vector.broadcast %49 : f32 to vector<1x8x128xf32>
      %52 = arith.addf %50, %51 : vector<1x8x128xf32>
      %c0_23 = arith.constant 0 : index
      %c0_24 = arith.constant 0 : index
      %c0_25 = arith.constant 0 : index
      %53 = vector.load %arg4[%c0_23, %c0_24, %c0_25] : memref<1x8x128xf32, #tpu.memory_space<vmem>>, vector<1x8x128xf32>
      tpu.vector_store %arg4[%c0_23, %c0_24, %c0_25], %52 {strides = array<i32>} : memref<1x8x128xf32, #tpu.memory_space<vmem>>, vector<1x8x128xf32>,
    } else {
    }
    return
  }
  func.func @transform_0(%arg0: i32, %arg1: i32) -> (i32, i32) {
    %c1_i32 = arith.constant 1 : i32
    %0 = arith.muli %arg0, %c1_i32 : i32
    %1 = arith.addi %0, %arg1 : i32
    %c0_i32 = arith.constant 0 : i32
    %2 = arith.minsi %1, %c0_i32 : i32
    %c0_i32_0 = arith.constant 0 : i32
    %c0_i32_1 = arith.constant 0 : i32
    return %2, %c0_i32_0 : i32, i32
  }
  func.func @transform_1(%arg0: i32, %arg1: i32) -> (i32, i32) {
    %c1_i32 = arith.constant 1 : i32
    %0 = arith.muli %arg0, %c1_i32 : i32
    %1 = arith.addi %0, %arg1 : i32
    %c0_i32 = arith.constant 0 : i32
    %2 = arith.minsi %1, %c0_i32 : i32
    %c0_i32_0 = arith.constant 0 : i32
    %c0_i32_1 = arith.constant 0 : i32
    return %2, %c0_i32_0 : i32, i32
  }
  func.func @transform_2(%arg0: i32, %arg1: i32) -> (i32, i32, i32) {
    %c0_i32 = arith.constant 0 : i32
    %c0_i32_0 = arith.constant 0 : i32
    %c0_i32_1 = arith.constant 0 : i32
    return %arg0, %c0_i32, %c0_i32_0 : i32, i32, i32
  }
}

</mosaic_0001>

<bundles_post_ra>
// kernel: tpu_custom_call.1
= control target key start
LH: loop header
LB: loop body
LE: loop exit
PB: predicated region body
PF: predicated region fallthrough
CT: control target
= control target key end

     0   :  { %7 = vsyncpa [#allocation4], 0  ;;  %s296_s0 = inlined_call_operand.hbm [shape: f32[16,128], index: 0, kind: input, shape index: {}]   ;;  %s297_s1 = inlined_call_operand.hbm [shape: f32[16,128], index: 1, kind: input, shape index: {}]   ;;  %s298_s2 = inlined_call_operand.hbm [shape: f32[1,8,128], index: 2, kind: output, shape index: {}]  }
   0x1   :  { %8 = vsyncpa [#allocation7], 0 }
   0x2   :  { %9 = vsyncpa [#allocation5], 0  ;;  %s20_s11 = sshll.u32 %s296_s0, 4  ;;  %s267_s12 = smov [#allocation3]   ;;  %s21_s11 = int_to_ptr.hbm [resolvable:$true] %s20_s11 }
   0x3   :  { %s22_s13 = sshll.u32 %s267_s12, 4  ;;  %s39_s16 = sshll.u32 %s297_s1, 4  ;;  %s23_s13 = int_to_ptr.vmem [resolvable:$true] %s22_s13  ;;  %s40_s16 = int_to_ptr.hbm [resolvable:$true] %s39_s16 }
   0x4   :  { %s268_s17 = smov 128   ;;  %s269_s18 = smov 8  }
   0x5   :  { %28 = dma.hbm_to_vmem [thread:$0]  %s21_s11, 256, %s23_s13, [#allocation4], %s268_s17, %s268_s17, %s269_s18  }
   0x6   :  { %s270_s19 = smov [#allocation6]  }
   0x7   :  { %s41_s20 = sshll.u32 %s270_s19, 4  ;;  %s42_s20 = int_to_ptr.vmem [resolvable:$true] %s41_s20 }
   0x8   :  { %47 = dma.hbm_to_vmem [thread:$0]  %s40_s16, 256, %s42_s20, [#allocation7], %s268_s17, %s268_s17, %s269_s18  }
   0x9   :  { %261 = dma.done.wait [#allocation4], 256  }
   0xa   :  { %262 = vsyncadd [#allocation4], 4294967040 }
   0xb   :  { %263 = dma.done.wait [#allocation7], 256  }
   0xc   :  { %264 = vsyncadd [#allocation7], 4294967040  ;;  %v70_v0 = vld [vmem:[#allocation3] sm:$0xff]  ;;  %v71_v1 = vld [vmem:[#allocation3 + $0x8] sm:$0xff]  ;;  %s271_s0 = smov [#allocation8]   ;;  %s155_s23 = sshll.u32 %s298_s2, 4  ;;  %s156_s23 = int_to_ptr.hbm [resolvable:$true] %s155_s23 }
   0xd   :  { %177 = vlog2.f32 %v70_v0  ;;  %v80_v2 = vsub.f32 1.0, %v70_v0  ;;  %v81_v3 = vsub.f32 1.0, %v71_v1  ;;  %v72_v5 = vld [vmem:[#allocation6] sm:$0xff]  ;;  %v73_v7 = vld [vmem:[#allocation6 + $0x8] sm:$0xff]  ;;  %s153_s1 = sshll.u32 %s271_s0, 4  ;;  %s154_s1 = int_to_ptr.vmem [resolvable:$true] %s153_s1 }
   0xe   :  { %179 = vlog2.f32 %v71_v1  ;;  %v90_v14 = vsub.f32 1.0, %v72_v5  ;;  %v91_v17 = vsub.f32 1.0, %v73_v7 }
   0xf   :  { %181 = vlog2.f32 %v80_v2 }
  0x10   :  { %183 = vlog2.f32 %v81_v3 }
  0x13   :  { %v178_v4 = vpop.eup %177 }
  0x14   :  { %v180_v6 = vpop.eup %179  ;;  %v75_v8 = vmul.f32 0.6931472, %v178_v4 }
  0x15   :  { %v182_v9 = vpop.eup %181  ;;  %v77_v10 = vmul.f32 0.6931472, %v180_v6 }
  0x16   :  { %v184_v11 = vpop.eup %183  ;;  %v78_v12 = vmax.f32 %v75_v8, -100.0  ;;  %v83_v13 = vmul.f32 0.6931472, %v182_v9 }
  0x17   :  { %v79_v15 = vmax.f32 %v77_v10, -100.0  ;;  %v85_v16 = vmul.f32 0.6931472, %v184_v11 }
  0x18   :  { %v86_v18 = vmax.f32 %v83_v13, -100.0  ;;  %v88_v19 = vmul.f32 %v78_v12, %v72_v5 }
  0x19   :  { %v87_v20 = vmax.f32 %v85_v16, -100.0  ;;  %v89_v21 = vmul.f32 %v79_v15, %v73_v7 }
  0x1a   :  { %v92_v22 = vmul.f32 %v90_v14, %v86_v18 }
  0x1b   :  { %v93_v23 = vmul.f32 %v91_v17, %v87_v20 }
  0x1c   :  { %v94_v24 = vadd.f32 %v92_v22, %v88_v19 }
  0x1d   :  { %v95_v25 = vadd.f32 %v93_v23, %v89_v21 }
  0x1e   :  { %v96_v26 = vsub.f32 0.0, %v94_v24 }
  0x1f   :  { %v97_v27 = vsub.f32 0.0, %v95_v25 }
  0x20   :  { %v98_v28 = vsub.f32 0.0, %v96_v26 }
  0x21   :  { %v99_v29 = vsub.f32 0.0, %v97_v27 }
  0x22   :  { %v100_v30 = vmul.f32 1.442695, %v98_v28 }
  0x23   :  { %v102_v31 = vmul.f32 1.442695, %v99_v29 }
  0x24   :  { %185 = vpow2.f32 %v100_v30 }
  0x25   :  { %187 = vpow2.f32 %v102_v31 }
  0x2a   :  { %v186_v32 = vpop.eup %185 }
  0x2b   :  { %v188_v33 = vpop.eup %187  ;;  %v104_v34 = vsub.f32 1.0, %v186_v32 }
  0x2c   :  { %v105_v35 = vsub.f32 1.0, %v188_v33 }
  0x2d   :  { %v106_v36 = vmul.f32 %v104_v34, %v104_v34 }
  0x2e   :  { %v107_v37 = vmul.f32 %v105_v35, %v105_v35 }
  0x2f   :  { %v108_v38 = vmul.f32 0.5, %v106_v36 }
  0x30   :  { %v109_v39 = vmul.f32 0.5, %v107_v37 }
  0x31   :  { %v110_v40 = vmul.f32 %v108_v38, %v96_v26 }
  0x32   :  { %v111_v41 = vmul.f32 %v109_v39, %v97_v27 }
  0x34   :  { %v135_v42 = vadd.f32 %v111_v41, %v110_v40 }
  0x36   :  { %136 = vadd.xlane.f32.xlu0 %v135_v42 }
  0xa9   :  { %v137_v43 = vpop.xlane.xlu0 %136 }
  0xaa   :  { %v138_v44 = vrot.slane %v137_v43, 4 }
  0xac   :  { %v139_v45 = vadd.f32 %v138_v44, %v137_v43 }
  0xae   :  { %v140_v46 = vrot.slane %v139_v45, 2 }
  0xb0   :  { %v141_v47 = vadd.f32 %v140_v46, %v139_v45 }
  0xb2   :  { %v142_v48 = vrot.slane %v141_v47, 1 }
  0xb4   :  { %v143_v49 = vadd.f32 %v142_v48, %v141_v47 }
  0xb6   :  { %170 = vpush %v143_v49 }
  0xe7   :  { %s171_s24 = spop %170 }
  0xe8   :  { %v145_v50 = vstv %s171_s24 }
  0xe9   :  { %147 = vst [vmem:[#allocation8] sm:$0xff] %v145_v50 }
  0xea   :  { %158 = dma.vmem_to_hbm [thread:$0]  %s154_s1, 128, %s156_s23, [#allocation5]  }
  0xeb   :  { %265 = dma.done.wait [#allocation5], 128  }
  0xec   :  { %266 = vsyncadd [#allocation5], 4294967168 }
  0xed   :  { %163 = vsyncpa [#allocation4], 1 }
  0xee   :  { %164 = vsyncpa [#allocation7], 1 }
  0xef   :  { %165 = vsyncpa [#allocation5], 1 }

</bundles_post_ra>
